<compile_context>
chip_gen: v7x
topology: tpu7x:2x2x1
jax: 0.10.0
libtpu: 0.0.40
codegen_flags: <defaults>
</compile_context>

<pallas_src>
import jax
import jax.numpy as jnp
from jax.experimental import pallas as pl
from jax.experimental.pallas import tpu as pltpu

LANE = 128      # lane width used only for the (tiny, resident) weight padding
SUBLANE = 16    # batch-tile granularity (bf16 sublane packing = 16 rows)


def mlp_kernel(x_ref, w1_ref, b1_ref, w2_ref, b2_ref, w3_ref, b3_ref, o_ref):
    # layer 1: Linear + ReLU  (bf16 MXU operands, f32 accumulate / elementwise)
    h = jnp.dot(x_ref[...], w1_ref[...], preferred_element_type=jnp.float32)
    h = jnp.maximum(h + b1_ref[...], 0.0)
    # layer 2: Linear + ReLU
    h = jnp.dot(h.astype(jnp.bfloat16), w2_ref[...],
                preferred_element_type=jnp.float32)
    h = jnp.maximum(h + b2_ref[...], 0.0)
    # layer 3: Linear (no activation, matches the PyTorch forward)
    out = jnp.dot(h.astype(jnp.bfloat16), w3_ref[...],
                  preferred_element_type=jnp.float32)
    o_ref[...] = (out + b3_ref[...]).astype(o_ref.dtype)


def _round_up(n, m):
    return ((n + m - 1) // m) * m


def _pad2(a, rows, cols):
    return jnp.pad(a, ((0, rows - a.shape[0]), (0, cols - a.shape[1])))


def neural_net_forward(x, w1, b1, w2, b2, w3, b3, *, block_batch=1024):
    """Fused 3-layer MLP.  x: (B, input_size) -> logits (B, num_classes) f32.

    Weights are (in, out) so the kernel computes x @ W + b (equivalent to
    PyTorch's x @ W.T with its (out, in) storage).  Biases are (1, out).
    """
    B, in_f = x.shape
    hid = w1.shape[1]
    cls = w3.shape[1]
    hid_p = _round_up(hid, LANE)

    # Batch tile: multiple of 16 (bf16 sublane packing); cap so the grid has
    # at least 2 "parallel" steps -> both v7x TensorCores get work.
    tb = min(block_batch, max(SUBLANE, _round_up(pl.cdiv(B, 2), SUBLANE)))
    grid = (pl.cdiv(B, tb),)

    # Streamed input in bf16 (no batch / K padding copies in HBM).
    x_bf = x.astype(jnp.bfloat16)

    # Resident weights in bf16; only the hidden (lane) dims are zero-padded.
    w1_p = _pad2(w1, in_f, hid_p).astype(jnp.bfloat16)
    w2_p = _pad2(w2, hid_p, hid_p).astype(jnp.bfloat16)
    w3_p = _pad2(w3, hid_p, cls).astype(jnp.bfloat16)
    # Biases stay f32 (bias add / ReLU run in f32 inside the kernel).
    b1_p = _pad2(b1.astype(jnp.float32), 1, hid_p)
    b2_p = _pad2(b2.astype(jnp.float32), 1, hid_p)
    b3_p = b3.astype(jnp.float32).reshape(1, cls)

    # Invariant operands: constant block index -> DMA'd once, VMEM-resident.
    const = lambda a: pl.BlockSpec(a.shape, lambda i: (0, 0))

    # VMEM budget from actual tile sizes (double-buffered x/out tiles,
    # resident weights/biases, f32 intermediates) plus headroom.
    tile_bytes = tb * in_f * 2 + tb * cls * 4
    resident_bytes = ((w1_p.size + w2_p.size + w3_p.size) * 2
                      + (b1_p.size + b2_p.size + b3_p.size) * 4)
    interm_bytes = 2 * tb * hid_p * 4
    vmem_limit = min(32 * 1024 * 1024,
                     max(4 * 1024 * 1024,
                         2 * tile_bytes + resident_bytes + interm_bytes
                         + 2 * 1024 * 1024))

    flops = 2 * B * (in_f * hid_p + hid_p * hid_p + hid_p * cls)
    bytes_accessed = (x_bf.size * 2 + resident_bytes + B * cls * 4)

    out = pl.pallas_call(
        mlp_kernel,
        out_shape=jax.ShapeDtypeStruct((B, cls), jnp.float32),
        grid=grid,
        in_specs=[
            pl.BlockSpec((tb, in_f), lambda i: (i, 0)),   # streamed x tiles
            const(w1_p), const(b1_p),
            const(w2_p), const(b2_p),
            const(w3_p), const(b3_p),
        ],
        out_specs=pl.BlockSpec((tb, cls), lambda i: (i, 0)),
        compiler_params=pltpu.CompilerParams(
            dimension_semantics=("parallel",),            # megacore on v7x
            vmem_limit_bytes=int(vmem_limit),
        ),
        cost_estimate=pl.CostEstimate(
            flops=int(flops), transcendentals=0,
            bytes_accessed=int(bytes_accessed)),
    )(x_bf, w1_p, b1_p, w2_p, b2_p, w3_p, b3_p)

    return out


def init_params(key, input_size, hidden_size, num_classes):
    """Deterministic init mimicking PyTorch's U(-1/sqrt(fan_in), 1/sqrt(fan_in))."""
    def linear(k, fan_in, fan_out):
        kw, kb = jax.random.split(k)
        bound = 1.0 / jnp.sqrt(float(fan_in))
        w = jax.random.uniform(kw, (fan_in, fan_out), jnp.float32, -bound, bound)
        b = jax.random.uniform(kb, (1, fan_out), jnp.float32, -bound, bound)
        return w, b

    k1, k2, k3 = jax.random.split(key, 3)
    w1, b1 = linear(k1, input_size, hidden_size)
    w2, b2 = linear(k2, hidden_size, hidden_size)
    w3, b3 = linear(k3, hidden_size, num_classes)
    return w1, b1, w2, b2, w3, b3


if __name__ == "__main__":
    # Small synthetic shapes consistent with the module's forward:
    # x: (batch, input_size) bag-of-words vector -> logits (batch, num_classes).
    # batch=256 exercises a 2-step grid (tb auto-caps at 128 so both v7x TCs
    # would get work) while staying small.
    batch, input_size, hidden_size, num_classes = 256, 32, 32, 16

    key = jax.random.PRNGKey(0)
    kx, kp = jax.random.split(key)
    x = jax.random.normal(kx, (batch, input_size), jnp.float32)
    params = init_params(kp, input_size, hidden_size, num_classes)

    out = neural_net_forward(x, *params, block_batch=1024)
    out = jax.block_until_ready(out)
    assert out.shape == (batch, num_classes)

    w1, b1, w2, b2, w3, b3 = params

    # Reference 1: same numerics as the kernel (bf16 operands, f32 accumulate).
    def bdot(a, w):
        return jnp.dot(a.astype(jnp.bfloat16), w.astype(jnp.bfloat16),
                       preferred_element_type=jnp.float32)
    ref_bf16 = jnp.maximum(bdot(x, w1) + b1, 0.0)
    ref_bf16 = jnp.maximum(bdot(ref_bf16, w2) + b2, 0.0)
    ref_bf16 = bdot(ref_bf16, w3) + b3
    assert jnp.allclose(out, ref_bf16, atol=1e-2, rtol=1e-2)

    # Reference 2: pure f32 PyTorch-equivalent math (loose tol for bf16 cast).
    ref_f32 = jnp.maximum(x @ w1 + b1, 0.0)
    ref_f32 = jnp.maximum(ref_f32 @ w2 + b2, 0.0)
    ref_f32 = ref_f32 @ w3 + b3
    assert jnp.allclose(out, ref_f32, atol=6e-2, rtol=6e-2)

    print("KERNEL_OK")
</pallas_src>

<mosaic_0001>
module attributes {stable_mosaic.version = 11 : i64} {
  func.func @mlp_kernel(%arg0: i32, %arg1: memref<128x32xbf16, #tpu.memory_space<vmem>>, %arg2: memref<32x128xbf16, #tpu.memory_space<vmem>>, %arg3: memref<1x128xf32, #tpu.memory_space<vmem>>, %arg4: memref<128x128xbf16, #tpu.memory_space<vmem>>, %arg5: memref<1x128xf32, #tpu.memory_space<vmem>>, %arg6: memref<128x16xbf16, #tpu.memory_space<vmem>>, %arg7: memref<1x16xf32, #tpu.memory_space<vmem>>, %arg8: memref<128x16xf32, #tpu.memory_space<vmem>>) attributes {dimension_semantics = [#tpu.dimension_semantics<parallel>], iteration_bounds = array<i64: 2>, scalar_prefetch = 0 : i64, scratch_operands = 0 : i64, tpu.core_type = #tpu.core_type<tc>, window_params = [{transform_indices = @transform_0, window_bounds = array<i64: 128, 32>}, {pipeline_mode = #tpu.pipeline_mode<synchronous>, transform_indices = @transform_1, window_bounds = array<i64: 32, 128>}, {pipeline_mode = #tpu.pipeline_mode<synchronous>, transform_indices = @transform_2, window_bounds = array<i64: 1, 128>}, {pipeline_mode = #tpu.pipeline_mode<synchronous>, transform_indices = @transform_3, window_bounds = array<i64: 128, 128>}, {pipeline_mode = #tpu.pipeline_mode<synchronous>, transform_indices = @transform_4, window_bounds = array<i64: 1, 128>}, {pipeline_mode = #tpu.pipeline_mode<synchronous>, transform_indices = @transform_5, window_bounds = array<i64: 128, 16>}, {pipeline_mode = #tpu.pipeline_mode<synchronous>, transform_indices = @transform_6, window_bounds = array<i64: 1, 16>}, {transform_indices = @transform_7, window_bounds = array<i64: 128, 16>}]} {
    %c0 = arith.constant 0 : index
    %c0_0 = arith.constant 0 : index
    %0 = vector.load %arg1[%c0, %c0_0] : memref<128x32xbf16, #tpu.memory_space<vmem>>, vector<128x32xbf16>
    %c0_1 = arith.constant 0 : index
    %c0_2 = arith.constant 0 : index
    %1 = vector.load %arg2[%c0_1, %c0_2] : memref<32x128xbf16, #tpu.memory_space<vmem>>, vector<32x128xbf16>
    %cst = arith.constant dense<0.000000e+00> : vector<128x128xf32>
    %2 = tpu.matmul %0, %1, %cst {dimension_numbers = #tpu.dot_dimension_numbers<[1], [0], [0], [1], [0, 0, 1, 1], [], []>} : vector<128x32xbf16>, vector<32x128xbf16>, vector<128x128xf32> -> vector<128x128xf32>
    %c0_3 = arith.constant 0 : index
    %c0_4 = arith.constant 0 : index
    %3 = vector.load %arg3[%c0_3, %c0_4] : memref<1x128xf32, #tpu.memory_space<vmem>>, vector<1x128xf32>
    %4 = vector.broadcast %3 : vector<1x128xf32> to vector<128x128xf32>
    %5 = arith.addf %2, %4 : vector<128x128xf32>
    %cst_5 = arith.constant 0.000000e+00 : f32
    %6 = vector.broadcast %cst_5 : f32 to vector<128x128xf32>
    %7 = arith.maximumf %5, %6 : vector<128x128xf32>
    %8 = arith.truncf %7 : vector<128x128xf32> to vector<128x128xbf16>
    %c0_6 = arith.constant 0 : index
    %c0_7 = arith.constant 0 : index
    %9 = vector.load %arg4[%c0_6, %c0_7] : memref<128x128xbf16, #tpu.memory_space<vmem>>, vector<128x128xbf16>
    %cst_8 = arith.constant dense<0.000000e+00> : vector<128x128xf32>
    %10 = tpu.matmul %8, %9, %cst_8 {dimension_numbers = #tpu.dot_dimension_numbers<[1], [0], [0], [1], [0, 0, 1, 1], [], []>} : vector<128x128xbf16>, vector<128x128xbf16>, vector<128x128xf32> -> vector<128x128xf32>
    %c0_9 = arith.constant 0 : index
    %c0_10 = arith.constant 0 : index
    %11 = vector.load %arg5[%c0_9, %c0_10] : memref<1x128xf32, #tpu.memory_space<vmem>>, vector<1x128xf32>
    %12 = vector.broadcast %11 : vector<1x128xf32> to vector<128x128xf32>
    %13 = arith.addf %10, %12 : vector<128x128xf32>
    %cst_11 = arith.constant 0.000000e+00 : f32
    %14 = vector.broadcast %cst_11 : f32 to vector<128x128xf32>
    %15 = arith.maximumf %13, %14 : vector<128x128xf32>
    %16 = arith.truncf %15 : vector<128x128xf32> to vector<128x128xbf16>
    %c0_12 = arith.constant 0 : index
    %c0_13 = arith.constant 0 : index
    %17 = vector.load %arg6[%c0_12, %c0_13] : memref<128x16xbf16, #tpu.memory_space<vmem>>, vector<128x16xbf16>
    %cst_14 = arith.constant dense<0.000000e+00> : vector<128x16xf32>
    %18 = tpu.matmul %16, %17, %cst_14 {dimension_numbers = #tpu.dot_dimension_numbers<[1], [0], [0], [1], [0, 0, 1, 1], [], []>} : vector<128x128xbf16>, vector<128x16xbf16>, vector<128x16xf32> -> vector<128x16xf32>
    %c0_15 = arith.constant 0 : index
    %c0_16 = arith.constant 0 : index
    %19 = vector.load %arg7[%c0_15, %c0_16] : memref<1x16xf32, #tpu.memory_space<vmem>>, vector<1x16xf32>
    %20 = vector.broadcast %19 : vector<1x16xf32> to vector<128x16xf32>
    %21 = arith.addf %18, %20 : vector<128x16xf32>
    %c0_17 = arith.constant 0 : index
    %c0_18 = arith.constant 0 : index
    %22 = vector.load %arg8[%c0_17, %c0_18] : memref<128x16xf32, #tpu.memory_space<vmem>>, vector<128x16xf32>
    tpu.vector_store %arg8[%c0_17, %c0_18], %21 {strides = array<i32>} : memref<128x16xf32, #tpu.memory_space<vmem>>, vector<128x16xf32>,
    return
  }
  func.func @transform_0(%arg0: i32) -> (i32, i32) {
    %c0_i32 = arith.constant 0 : i32
    %c0_i32_0 = arith.constant 0 : i32
    return %arg0, %c0_i32 : i32, i32
  }
  func.func @transform_1(%arg0: i32) -> (i32, i32) {
    %c0_i32 = arith.constant 0 : i32
    %c0_i32_0 = arith.constant 0 : i32
    %c0_i32_1 = arith.constant 0 : i32
    return %c0_i32, %c0_i32_0 : i32, i32
  }
  func.func @transform_2(%arg0: i32) -> (i32, i32) {
    %c0_i32 = arith.constant 0 : i32
    %c0_i32_0 = arith.constant 0 : i32
    %c0_i32_1 = arith.constant 0 : i32
    return %c0_i32, %c0_i32_0 : i32, i32
  }
  func.func @transform_3(%arg0: i32) -> (i32, i32) {
    %c0_i32 = arith.constant 0 : i32
    %c0_i32_0 = arith.constant 0 : i32
    %c0_i32_1 = arith.constant 0 : i32
    return %c0_i32, %c0_i32_0 : i32, i32
  }
  func.func @transform_4(%arg0: i32) -> (i32, i32) {
    %c0_i32 = arith.constant 0 : i32
    %c0_i32_0 = arith.constant 0 : i32
    %c0_i32_1 = arith.constant 0 : i32
    return %c0_i32, %c0_i32_0 : i32, i32
  }
  func.func @transform_5(%arg0: i32) -> (i32, i32) {
    %c0_i32 = arith.constant 0 : i32
    %c0_i32_0 = arith.constant 0 : i32
    %c0_i32_1 = arith.constant 0 : i32
    return %c0_i32, %c0_i32_0 : i32, i32
  }
  func.func @transform_6(%arg0: i32) -> (i32, i32) {
    %c0_i32 = arith.constant 0 : i32
    %c0_i32_0 = arith.constant 0 : i32
    %c0_i32_1 = arith.constant 0 : i32
    return %c0_i32, %c0_i32_0 : i32, i32
  }
  func.func @transform_7(%arg0: i32) -> (i32, i32) {
    %c0_i32 = arith.constant 0 : i32
    %c0_i32_0 = arith.constant 0 : i32
    return %arg0, %c0_i32 : i32, i32
  }
}

</mosaic_0001>

<bundles_post_ra>
// kernel: tpu_custom_call.1
= control target key start
LH: loop header
LB: loop body
LE: loop exit
PB: predicated region body
PF: predicated region fallthrough
CT: control target
= control target key end

     0   :  { %s1197_s24 = smov 0   ;;  %s1333_s0 = inlined_call_operand.vmem [shape: bf16[256,32], index: 0, kind: input, shape index: {}]   ;;  %s1334_s1 = inlined_call_operand.vmem [shape: bf16[32,128], index: 1, kind: input, shape index: {}]   ;;  %s1335_s2 = inlined_call_operand.vmem [shape: f32[1,128], index: 2, kind: input, shape index: {}]   ;;  %s1336_s3 = inlined_call_operand.vmem [shape: bf16[128,128], index: 3, kind: input, shape index: {}]   ;;  %s1337_s4 = inlined_call_operand.vmem [shape: f32[1,128], index: 4, kind: input, shape index: {}]   ;;  %s1338_s5 = inlined_call_operand.vmem [shape: bf16[128,16], index: 5, kind: input, shape index: {}]   ;;  %s1339_s6 = inlined_call_operand.vmem [shape: f32[1,16], index: 6, kind: input, shape index: {}]   ;;  %s1340_s7 = inlined_call_operand.vmem [shape: f32[256,16], index: 7, kind: output, shape index: {}]  }
   0x1 LB: > { %s941_s25 = sadd.s32 4294967295, %s1155_s24   ;;  %p945_p0 = scmp.ge.s32.totalorder %s1155_s24, 1  ;;  %s1155_s24 = sphi %s1197_s24, %s17_s24  }
   0x2   : > { %p238_p1 = scmp.lt.s32.totalorder %s1155_s24, 3 }
   0x4   : > { %p239_p2 = pnand %p945_p0, %p238_p1 }
   0x5   : > { %v1123_v0 = vld [vmem:[%s1334_s1] sm:$0xff] (!%p239_p2)   ;;  %s946_s28 = sshll.u32 (!%p239_p2), %s941_s25, 4  ;;  %v1124_v1 = vld [vmem:[%s1334_s1 + $0x8] sm:$0xff] (!%p239_p2)   ;;  %vm362_vm0 = vcmask (!%p239_p2), 261120   ;;  %v1135_v4 = vld [vmem:[%s1336_s3 + $0x10] sm:$0xff] (!%p239_p2)   ;;  %vm868_vm1 = vcmask (!%p239_p2), 130048  }
   0x6   : > { %242 = sbr.rel (%p239_p2) target bundleno = 704 (0x2c0), region = 48  ;;  %p271_p3 = scmp.lt.s32.totalorder (!%p239_p2), %s946_s28, 31  ;;  %1031 = vmatprep.subr.bf16.mxu0 (!%p239_p2), %v1123_v0  ;;  %v1133_v2 = vld [vmem:[%s1336_s3] sm:$0xff] (!%p239_p2)   ;;  %v1134_v3 = vld [vmem:[%s1336_s3 + $0x8] sm:$0xff] (!%p239_p2)   ;;  %v1136_v8 = vld [vmem:[%s1336_s3 + $0x18] sm:$0xff] (!%p239_p2)  }
   0x7   : > { %1032 = vmatpush3.bf16.msra.mxu0 (!%p239_p2), %v1123_v0  ;;  %1051 = vmatprep.subr.bf16.mxu1 (!%p239_p2), %v1133_v2  ;;  %v1137_v9 = vld [vmem:[%s1336_s3 + $0x20] sm:$0xff] (!%p239_p2)   ;;  %v1138_v12 = vld [vmem:[%s1336_s3 + $0x28] sm:$0xff] (!%p239_p2)   ;;  %v1139_v16 = vld [vmem:[%s1336_s3 + $0x30] sm:$0xff] (!%p239_p2)  }
   0x8   : > { %1033 = vmatprep.subr.bf16.mxu0 (!%p239_p2), %v1124_v1  ;;  %1052 = vmatpush3.bf16.msra.mxu1 (!%p239_p2), %v1133_v2  ;;  %v1140_v17 = vld [vmem:[%s1336_s3 + $0x38] sm:$0xff] (!%p239_p2)   ;;  %v1141_v18 = vld [vmem:[%s1338_s5] sm:$0xff] (!%p239_p2)   ;;  %v1142_v19 = vld [vmem:[%s1338_s5 + $0x8] sm:$0xff] (!%p239_p2)  }
   0x9   : > { %1053 = vmatprep.subr.bf16.mxu1 (!%p239_p2), %v1134_v3  ;;  %v1143_v20 = vld [vmem:[%s1338_s5 + $0x10] sm:$0xff] (!%p239_p2)   ;;  %v1144_v21 = vld [vmem:[%s1338_s5 + $0x18] sm:$0xff] (!%p239_p2)   ;;  %v1145_v22 = vld [vmem:[%s1338_s5 + $0x20] sm:$0xff] (!%p239_p2)  }
   0xa   : > { %v1146_v23 = vld [vmem:[%s1338_s5 + $0x28] sm:$0xff] (!%p239_p2)   ;;  %v950_v24 = vld [vmem:[%s1335_s2] ss:$0 sm:$0xff] (!%p239_p2) }
   0xb   : > { %1034 = vmatpush3.bf16.msra.mxu0 (!%p239_p2), %v1124_v1 }
   0xc   : > { %1054 = vmatpush3.bf16.msra.mxu1 (!%p239_p2), %v1134_v3  ;;  %1083 = vmatprep.subr.bf16.mxu0 (!%p239_p2), %v1141_v18 }
   0xd   : > { %s1342_s28 = smov (!%p271_p3, %s946_s28), 31  ;;  %1055 = vmatprep.subr.bf16.mxu1 %v1135_v4 }
   0xe   : > { %s947_s12 = sshll.u32 %s1342_s28, 2  ;;  %s949_s29 = sshll.u32 %s1342_s28, 3 }
   0xf   : > { %s1223_s15 = scalar_lea.vmem %s1333_s0, %s947_s12  ;;  %s1296_s11 = scalar_lea.vmem %s1340_s7, %s949_s29 }
  0x10   : > { %v1125_v5 = vld [vmem:[%s1223_s15] sm:$0xff]   ;;  %v1126_v6 = vld [vmem:[%s1223_s15 + $0x8] sm:$0xff]   ;;  %v1127_v7 = vld [vmem:[%s1223_s15 + $0x10] sm:$0xff]   ;;  %1056 = vmatpush3.bf16.msra.mxu1 %v1135_v4 }
  0x11   : > { %1035 = vmatprep.mubr.msk.bf16.mxu0 %vm362_vm0, %v1125_v5  ;;  %v1128_v10 = vld [vmem:[%s1223_s15 + $0x18] sm:$0xff]   ;;  %1057 = vmatprep.subr.bf16.mxu1 %v1136_v8  ;;  %v1129_v11 = vld [vmem:[%s1223_s15 + $0x20] sm:$0xff]   ;;  %v1130_v13 = vld [vmem:[%s1223_s15 + $0x28] sm:$0xff]  }
  0x12   : > { %1036 = vmatmul.mubr.msk.bf16.vlgmr.msra.gmra.mrb[0].mxu0 %vm362_vm0, %v1126_v6  ;;  %v1131_v14 = vld [vmem:[%s1223_s15 + $0x30] sm:$0xff]   ;;  %v1132_v15 = vld [vmem:[%s1223_s15 + $0x38] sm:$0xff]  }
  0x13   : > { %1039 = vmatprep.mubr.msk.bf16.mxu0 %vm362_vm0, %v1127_v7  ;;  %1084 = vmatpush3.bf16.msra.mxu0 %v1141_v18  ;;  %v1148_v18 = vld [vmem:[%s1338_s5 + $0x38] sm:$0xff]  }
  0x14   : > { %1058 = vmatpush3.bf16.msra.mxu1 %v1136_v8  ;;  %1085 = vmatprep.subr.bf16.mxu0 %v1142_v19 }
  0x15   : > { %1059 = vmatprep.subr.bf16.mxu1 %v1137_v9 }
  0x17   : > { %1086 = vmatpush3.bf16.msra.mxu0 %v1142_v19  ;;  %v969_v19 = vld [vmem:[%s1337_s4] ss:$0 sm:$0xff] }
  0x18   : > { %1060 = vmatpush3.bf16.msra.mxu1 %v1137_v9  ;;  %1087 = vmatprep.subr.bf16.mxu0 %v1143_v20 }
  0x19   : > { %1061 = vmatprep.subr.bf16.mxu1 %v1138_v12 }
  0x1a   : > { %1040 = vmatmul.mubr.msk.bf16.gmra.mrb[4].mxu0 %vm362_vm0, %v1128_v10 }
  0x1b   : > { %1043 = vmatprep.mubr.msk.bf16.mxu0 %vm362_vm0, %v1129_v11  ;;  %1088 = vmatpush3.bf16.msra.mxu0 %v1143_v20 }
  0x1c   : > { %1062 = vmatpush3.bf16.msra.mxu1 %v1138_v12  ;;  %1089 = vmatprep.subr.bf16.mxu0 %v1144_v21 }
  0x1d   : > { %1063 = vmatprep.subr.bf16.mxu1 %v1139_v16 }
  0x1f   : > { %1090 = vmatpush3.bf16.msra.mxu0 %v1144_v21 }
  0x20   : > { %1064 = vmatpush3.bf16.msra.mxu1 %v1139_v16  ;;  %1091 = vmatprep.subr.bf16.mxu0 %v1145_v22 }
  0x21   : > { %1065 = vmatprep.subr.bf16.mxu1 %v1140_v17 }
  0x22   : > { %1044 = vmatmul.mubr.msk.bf16.gmra.mrb[8].mxu0 %vm362_vm0, %v1130_v13 }
  0x23   : > { %1047 = vmatprep.mubr.msk.bf16.mxu0 %vm362_vm0, %v1131_v14  ;;  %1092 = vmatpush3.bf16.msra.mxu0 %v1145_v22 }
  0x24   : > { %1066 = vmatpush3.bf16.msra.mxu1 %v1140_v17  ;;  %1093 = vmatprep.subr.bf16.mxu0 %v1146_v23  ;;  %v1147_v17 = vld [vmem:[%s1338_s5 + $0x30] sm:$0xff]  }
  0x27   : > { %1094 = vmatpush3.bf16.msra.mxu0 %v1146_v23 }
  0x28   : > { %1095 = vmatprep.subr.bf16.mxu0 %v1147_v17 }
  0x2a   : > { %1048 = vmatmul.mubr.msk.bf16.gmra.mrb[12].mxu0 %vm362_vm0, %v1132_v15 }
  0x2b   : > { %1096 = vmatpush3.bf16.msra.mxu0 %v1147_v17 }
  0x2c   : > { %1097 = vmatprep.subr.bf16.mxu0 %v1148_v18 }
  0x2f   : > { %1098 = vmatpush3.bf16.msra.mxu0 %v1148_v18 }
  0xe5   : > { %v1037_v25 = vpop.f32.mrb[0].mxu0 }
  0xe6   : > { %v430_v26 = vadd.f32 %v1037_v25, %v950_v24  ;;  %v421_v27 = vpop.f32.mrb[1].mxu0 }
  0xe7   : > { %v422_v28 = vadd.f32 %v950_v24, %v421_v27  ;;  %v1038_v29 = vpop.f32.mrb[2].mxu0 }
  0xe8   : > { %v433_v30 = vadd.f32 %v1038_v29, %v950_v24  ;;  %v424_v31 = vpop.f32.mrb[3].mxu0  ;;  %v486_v33 = vmax.f32 %v430_v26, 0.0 }
  0xe9   : > { %v425_v32 = vadd.f32 %v950_v24, %v424_v31  ;;  %v484_v35 = vmax.f32 %v422_v28, 0.0 }
  0xea   : > { %v487_v34 = vmax.f32 %v433_v30, 0.0 }
  0xeb   : > { %v485_v36 = vmax.f32 %v425_v32, 0.0 }
  0xec   : > { %v501_v37 = vpack.c.bf16 %v487_v34, %v486_v33 }
  0xed   : > { %v1041_v38 = vpop.f32.mrb[4].mxu0  ;;  %v500_v39 = vpack.c.bf16 %v485_v36, %v484_v35 }
  0xee   : > { %v446_v40 = vadd.f32 %v1041_v38, %v950_v24  ;;  %v437_v41 = vpop.f32.mrb[5].mxu0 }
  0xef   : > { %v438_v42 = vadd.f32 %v950_v24, %v437_v41  ;;  %v1042_v43 = vpop.f32.mrb[6].mxu0  ;;  %1067 = vmatprep.mubr.bf16.mxu1 %v500_v39 }
  0xf0   : > { %v449_v44 = vadd.f32 %v1042_v43, %v950_v24  ;;  %v440_v45 = vpop.f32.mrb[7].mxu0  ;;  %1068 = vmatmul.mubr.bf16.vlgmr.msra.gmra.mrb[0].mxu1 %v501_v37  ;;  %v490_v47 = vmax.f32 %v446_v40, 0.0 }
  0xf1   : > { %v441_v46 = vadd.f32 %v950_v24, %v440_v45  ;;  %v488_v49 = vmax.f32 %v438_v42, 0.0 }
  0xf2   : > { %v491_v48 = vmax.f32 %v449_v44, 0.0 }
  0xf3   : > { %v489_v50 = vmax.f32 %v441_v46, 0.0 }
  0xf4   : > { %v503_v51 = vpack.c.bf16 %v491_v48, %v490_v47 }
  0xf5   : > { %v502_v52 = vpack.c.bf16 %v489_v50, %v488_v49  ;;  %v1045_v53 = vpop.f32.mrb[8].mxu0 }
  0xf6   : > { %v462_v54 = vadd.f32 %v1045_v53, %v950_v24  ;;  %v453_v55 = vpop.f32.mrb[9].mxu0 }
  0xf7   : > { %v454_v56 = vadd.f32 %v950_v24, %v453_v55  ;;  %v1046_v57 = vpop.f32.mrb[10].mxu0  ;;  %1071 = vmatprep.mubr.bf16.mxu1 %v502_v52 }
  0xf8   : > { %v465_v58 = vadd.f32 %v1046_v57, %v950_v24  ;;  %v456_v59 = vpop.f32.mrb[11].mxu0  ;;  %1072 = vmatmul.mubr.bf16.gmra.mrb[4].mxu1 %v503_v51  ;;  %v494_v61 = vmax.f32 %v462_v54, 0.0 }
  0xf9   : > { %v457_v60 = vadd.f32 %v950_v24, %v456_v59  ;;  %v492_v63 = vmax.f32 %v454_v56, 0.0 }
  0xfa   : > { %v495_v62 = vmax.f32 %v465_v58, 0.0 }
  0xfb   : > { %v493_v0 = vmax.f32 %v457_v60, 0.0 }
  0xfc   : > { %v505_v1 = vpack.c.bf16 %v495_v62, %v494_v61 }
  0xfd   : > { %v504_v2 = vpack.c.bf16 %v493_v0, %v492_v63  ;;  %v1049_v3 = vpop.f32.mrb[12].mxu0 }
  0xfe   : > { %v478_v4 = vadd.f32 %v1049_v3, %v950_v24  ;;  %v469_v5 = vpop.f32.mrb[13].mxu0 }
  0xff   : > { %v470_v6 = vadd.f32 %v950_v24, %v469_v5  ;;  %v1050_v7 = vpop.f32.mrb[14].mxu0  ;;  %1075 = vmatprep.mubr.bf16.mxu1 %v504_v2 }
 0x100   : > { %v481_v8 = vadd.f32 %v1050_v7, %v950_v24  ;;  %v472_v9 = vpop.f32.mrb[15].mxu0  ;;  %1076 = vmatmul.mubr.bf16.gmra.mrb[8].mxu1 %v505_v1  ;;  %v498_v11 = vmax.f32 %v478_v4, 0.0 }
 0x101   : > { %v473_v10 = vadd.f32 %v950_v24, %v472_v9  ;;  %v496_v13 = vmax.f32 %v470_v6, 0.0 }
 0x102   : > { %v499_v12 = vmax.f32 %v481_v8, 0.0 }
 0x103   : > { %v497_v14 = vmax.f32 %v473_v10, 0.0 }
 0x104   : > { %v507_v15 = vpack.c.bf16 %v499_v12, %v498_v11  ;;  %v978_v12 = vld [vmem:[%s1339_s6] ss:$0 sm:$0xff] }
 0x105   : > { %v506_v16 = vpack.c.bf16 %v497_v14, %v496_v13 }
 0x107   : > { %1079 = vmatprep.mubr.bf16.mxu1 %v506_v16 }
 0x108   : > { %1080 = vmatmul.mubr.bf16.gmra.mrb[12].mxu1 %v507_v15 }
 0x1c3   : > { %v1069_v20 = vpop.f32.mrb[0].mxu1 }
 0x1c4   : > { %v622_v21 = vadd.f32 %v1069_v20, %v969_v19  ;;  %v613_v22 = vpop.f32.mrb[1].mxu1 }
 0x1c5   : > { %v614_v23 = vadd.f32 %v969_v19, %v613_v22  ;;  %v1070_v24 = vpop.f32.mrb[2].mxu1 }
 0x1c6   : > { %v625_v25 = vadd.f32 %v1070_v24, %v969_v19  ;;  %v616_v26 = vpop.f32.mrb[3].mxu1  ;;  %v678_v28 = vmax.f32 %v622_v21, 0.0 }
 0x1c7   : > { %v617_v27 = vadd.f32 %v969_v19, %v616_v26  ;;  %v676_v30 = vmax.f32 %v614_v23, 0.0 }
 0x1c8   : > { %v679_v29 = vmax.f32 %v625_v25, 0.0 }
 0x1c9   : > { %v677_v31 = vmax.f32 %v617_v27, 0.0 }
 0x1ca   : > { %v693_v32 = vpack.c.bf16 %v679_v29, %v678_v28 }
 0x1cb   : > { %v692_v33 = vpack.c.bf16 %v677_v31, %v676_v30  ;;  %v1073_v34 = vpop.f32.mrb[4].mxu1 }
 0x1cc   : > { %v638_v35 = vadd.f32 %v1073_v34, %v969_v19  ;;  %v629_v36 = vpop.f32.mrb[5].mxu1 }
 0x1cd   : > { %v630_v37 = vadd.f32 %v969_v19, %v629_v36  ;;  %v1074_v38 = vpop.f32.mrb[6].mxu1  ;;  %1099 = vmatprep.mubr.bf16.mxu0 %v692_v33 }
 0x1ce   : > { %v641_v39 = vadd.f32 %v1074_v38, %v969_v19  ;;  %v632_v40 = vpop.f32.mrb[7].mxu1  ;;  %1100 = vmatmul.mubr.bf16.vlgmr.msra.gmra.mrb[16].mxu0 %v693_v32  ;;  %v682_v42 = vmax.f32 %v638_v35, 0.0 }
 0x1cf   : > { %v633_v41 = vadd.f32 %v969_v19, %v632_v40  ;;  %v680_v44 = vmax.f32 %v630_v37, 0.0 }
 0x1d0   : > { %v683_v43 = vmax.f32 %v641_v39, 0.0 }
 0x1d1   : > { %v681_v45 = vmax.f32 %v633_v41, 0.0 }
 0x1d2   : > { %v695_v46 = vpack.c.bf16 %v683_v43, %v682_v42 }
 0x1d3   : > { %v694_v47 = vpack.c.bf16 %v681_v45, %v680_v44  ;;  %v1077_v48 = vpop.f32.mrb[8].mxu1 }
 0x1d4   : > { %v654_v49 = vadd.f32 %v1077_v48, %v969_v19  ;;  %v645_v50 = vpop.f32.mrb[9].mxu1 }
 0x1d5   : > { %v646_v51 = vadd.f32 %v969_v19, %v645_v50  ;;  %v1078_v52 = vpop.f32.mrb[10].mxu1  ;;  %1103 = vmatprep.mubr.bf16.mxu0 %v694_v47 }
 0x1d6   : > { %v657_v53 = vadd.f32 %v1078_v52, %v969_v19  ;;  %v648_v54 = vpop.f32.mrb[11].mxu1  ;;  %1104 = vmatmul.mubr.bf16.gmra.mrb[20].mxu0 %v695_v46  ;;  %v686_v56 = vmax.f32 %v654_v49, 0.0 }
 0x1d7   : > { %v649_v55 = vadd.f32 %v969_v19, %v648_v54  ;;  %v684_v58 = vmax.f32 %v646_v51, 0.0 }
 0x1d8   : > { %v687_v57 = vmax.f32 %v657_v53, 0.0 }
 0x1d9   : > { %v685_v59 = vmax.f32 %v649_v55, 0.0 }
 0x1da   : > { %v697_v60 = vpack.c.bf16 %v687_v57, %v686_v56 }
 0x1db   : > { %v696_v61 = vpack.c.bf16 %v685_v59, %v684_v58  ;;  %v1081_v62 = vpop.f32.mrb[12].mxu1 }
 0x1dc   : > { %v670_v63 = vadd.f32 %v1081_v62, %v969_v19  ;;  %v661_v0 = vpop.f32.mrb[13].mxu1 }
 0x1dd   : > { %v662_v1 = vadd.f32 %v969_v19, %v661_v0  ;;  %v1082_v2 = vpop.f32.mrb[14].mxu1  ;;  %1107 = vmatprep.mubr.bf16.mxu0 %v696_v61 }
 0x1de   : > { %v673_v3 = vadd.f32 %v1082_v2, %v969_v19  ;;  %v664_v4 = vpop.f32.mrb[15].mxu1  ;;  %1108 = vmatmul.mubr.bf16.gmra.mrb[24].mxu0 %v697_v60  ;;  %v690_v6 = vmax.f32 %v670_v63, 0.0 }
 0x1df   : > { %v665_v5 = vadd.f32 %v969_v19, %v664_v4  ;;  %v688_v8 = vmax.f32 %v662_v1, 0.0 }
 0x1e0   : > { %v691_v7 = vmax.f32 %v673_v3, 0.0 }
 0x1e1   : > { %v689_v9 = vmax.f32 %v665_v5, 0.0 }
 0x1e2   : > { %v699_v10 = vpack.c.bf16 %v691_v7, %v690_v6 }
 0x1e3   : > { %v698_v11 = vpack.c.bf16 %v689_v9, %v688_v8 }
 0x1e5   : > { %1111 = vmatprep.mubr.bf16.mxu0 %v698_v11 }
 0x1e6   : > { %1112 = vmatmul.mubr.bf16.gmra.mrb[28].mxu0 %v699_v10 }
 0x2a1   : > { %v1101_v13 = vpop.f32.mrb[16].mxu0 }
 0x2a2   : > { %v814_v14 = vadd.f32 %v1101_v13, %v978_v12  ;;  %v805_v15 = vpop.f32.mrb[17].mxu0 }
 0x2a3   : > { %v806_v16 = vadd.f32 %v978_v12, %v805_v15  ;;  %v1102_v17 = vpop.f32.mrb[18].mxu0 }
 0x2a4   : > { %871 = vst.msk [vmem:[%s1296_s11 + $0x10] sm:$0xff] %vm868_vm1, %v814_v14  ;;  %v817_v18 = vadd.f32 %v1102_v17, %v978_v12  ;;  %v808_v19 = vpop.f32.mrb[19].mxu0 }
 0x2a5   : > { %869 = vst.msk [vmem:[%s1296_s11] sm:$0xff] %vm868_vm1, %v806_v16  ;;  %v809_v20 = vadd.f32 %v978_v12, %v808_v19 }
 0x2a6   : > { %872 = vst.msk [vmem:[%s1296_s11 + $0x18] sm:$0xff] %vm868_vm1, %v817_v18 }
 0x2a7   : > { %870 = vst.msk [vmem:[%s1296_s11 + $0x8] sm:$0xff] %vm868_vm1, %v809_v20 }
 0x2a9   : > { %v1105_v21 = vpop.f32.mrb[20].mxu0 }
 0x2aa   : > { %v830_v22 = vadd.f32 %v1105_v21, %v978_v12  ;;  %v821_v23 = vpop.f32.mrb[21].mxu0 }
 0x2ab   : > { %v822_v24 = vadd.f32 %v978_v12, %v821_v23  ;;  %v1106_v25 = vpop.f32.mrb[22].mxu0 }
 0x2ac   : > { %875 = vst.msk [vmem:[%s1296_s11 + $0x30] sm:$0xff] %vm868_vm1, %v830_v22  ;;  %v833_v26 = vadd.f32 %v1106_v25, %v978_v12  ;;  %v824_v27 = vpop.f32.mrb[23].mxu0 }
 0x2ad   : > { %873 = vst.msk [vmem:[%s1296_s11 + $0x20] sm:$0xff] %vm868_vm1, %v822_v24  ;;  %v825_v28 = vadd.f32 %v978_v12, %v824_v27 }
 0x2ae   : > { %876 = vst.msk [vmem:[%s1296_s11 + $0x38] sm:$0xff] %vm868_vm1, %v833_v26 }
 0x2af   : > { %874 = vst.msk [vmem:[%s1296_s11 + $0x28] sm:$0xff] %vm868_vm1, %v825_v28 }
 0x2b1   : > { %v1109_v29 = vpop.f32.mrb[24].mxu0 }
 0x2b2   : > { %v846_v30 = vadd.f32 %v1109_v29, %v978_v12  ;;  %v837_v31 = vpop.f32.mrb[25].mxu0 }
 0x2b3   : > { %v838_v32 = vadd.f32 %v978_v12, %v837_v31  ;;  %v1110_v33 = vpop.f32.mrb[26].mxu0 }
 0x2b4   : > { %879 = vst.msk [vmem:[%s1296_s11 + $0x50] sm:$0xff] %vm868_vm1, %v846_v30  ;;  %v849_v34 = vadd.f32 %v1110_v33, %v978_v12  ;;  %v840_v35 = vpop.f32.mrb[27].mxu0 }
 0x2b5   : > { %877 = vst.msk [vmem:[%s1296_s11 + $0x40] sm:$0xff] %vm868_vm1, %v838_v32  ;;  %v841_v36 = vadd.f32 %v978_v12, %v840_v35 }
 0x2b6   : > { %880 = vst.msk [vmem:[%s1296_s11 + $0x58] sm:$0xff] %vm868_vm1, %v849_v34 }
 0x2b7   : > { %878 = vst.msk [vmem:[%s1296_s11 + $0x48] sm:$0xff] %vm868_vm1, %v841_v36 }
 0x2b9   : > { %v1113_v37 = vpop.f32.mrb[28].mxu0 }
 0x2ba   : > { %v862_v38 = vadd.f32 %v1113_v37, %v978_v12  ;;  %v853_v39 = vpop.f32.mrb[29].mxu0 }
 0x2bb   : > { %v854_v40 = vadd.f32 %v978_v12, %v853_v39  ;;  %v1114_v41 = vpop.f32.mrb[30].mxu0 }
 0x2bc   : > { %883 = vst.msk [vmem:[%s1296_s11 + $0x70] sm:$0xff] %vm868_vm1, %v862_v38  ;;  %v865_v42 = vadd.f32 %v1114_v41, %v978_v12  ;;  %v856_v43 = vpop.f32.mrb[31].mxu0 }
 0x2bd   : > { %881 = vst.msk [vmem:[%s1296_s11 + $0x60] sm:$0xff] %vm868_vm1, %v854_v40  ;;  %v857_v44 = vadd.f32 %v978_v12, %v856_v43 }
 0x2be   : > { %884 = vst.msk [vmem:[%s1296_s11 + $0x78] sm:$0xff] %vm868_vm1, %v865_v42 }
 0x2bf   : > { %882 = vst.msk [vmem:[%s1296_s11 + $0x68] sm:$0xff] %vm868_vm1, %v857_v44 }
 0x2c0 PF: > { %s17_s24 = sadd.s32 1, %s1155_s24  }
 0x2c1   : > { %p14_p4 = scmp.ge.s32.totalorder %s17_s24, 4  }
 0x2c3   :  { %16 = sbr.rel (!%p14_p4) target bundleno = 1 (0x1), region = 78 }

</bundles_post_ra>
